<compile_context>
chip_gen: v7x
topology: tpu7x:2x2x1
jax: 0.10.0
libtpu: 0.0.40
codegen_flags: <defaults>
</compile_context>

<pallas_src>
import math

import jax
import jax.numpy as jnp
from jax.experimental import pallas as pl
from jax.experimental.pallas import tpu as pltpu

_CLAMP_MIN = 1e-6          # torch clamp(min=1e-6) used by the GeM branch
_LANE = 128
_MAX_IN_BLOCK_BYTES = 32 << 20   # per-input-block ceiling (amortizes ~0.35us/step overhead)
_CHUNK_F32_BYTES = 2 << 20       # in-kernel f32 temporary budget per sub-batch chunk
_TEMP_ALLOWANCE = 8 << 20        # VMEM reserved for those chunk temporaries
_DEFAULT_VMEM_CAP = 64 << 20     # v7x per-TC VMEM (safe fallback if query fails)


def _round_up(a: int, m: int) -> int:
    return -(-a // m) * m


def _ceil_div(a: int, b: int) -> int:
    return -(-a // b)


def _sublane_multiple(dtype) -> int:
    # f32 -> 8, bf16/f16 -> 16, int8/fp8 -> 32 (sublane packing)
    itemsize = jnp.dtype(dtype).itemsize
    return max(8, 32 // itemsize)


def _vmem_capacity_bytes() -> int:
    try:
        cap = int(pltpu.get_tpu_info().vmem_capacity_bytes)
        if cap > 0:
            return cap
    except Exception:
        pass
    return _DEFAULT_VMEM_CAP


def _is_integer_power(p) -> bool:
    try:
        p_f = float(p)
    except (TypeError, ValueError):
        return False
    return math.isfinite(p_f) and p_f.is_integer() and 2.0 <= p_f <= 64.0


def _pow_int(x, n: int):
    """x ** n for integer n >= 1 via exponentiation-by-squaring (VALU-only)."""
    result = None
    base = x
    while n > 0:
        if n & 1:
            result = base if result is None else result * base
        n >>= 1
        if n > 0:
            base = base * base
    return result


def _make_pool_kernel(p, hw: int, bt: int, sb: int):
    """Kernel body for a block [bt, C, HW] -> [bt, C], reduced in sb-row chunks."""
    inv_hw = 1.0 / float(hw)
    is_max = (p == float("inf"))
    is_mean = (p == 1)

    if not (is_max or is_mean):
        p_f = float(p)
        inv_p = 1.0 / p_f
        int_p = _is_integer_power(p_f)

    def chunk_reduce(xs):
        """[rows, C, HW] chunk -> [rows, C] pooled values."""
        if is_max:
            return jnp.max(xs, axis=-1)                       # exact in native dtype
        if is_mean:
            return jnp.sum(xs.astype(jnp.float32), axis=-1) * inv_hw
        # GeM branch
        xc = jnp.maximum(xs.astype(jnp.float32), _CLAMP_MIN)  # clamp(min=1e-6)
        if int_p:
            xp = _pow_int(xc, int(p_f))                       # VALU multiply chain
        elif p_f == 0.5:
            xp = jnp.sqrt(xc)
        else:
            xp = jnp.exp(p_f * jnp.log(xc))                   # fractional p: EUP path
        m = jnp.sum(xp, axis=-1) * inv_hw                     # spatial mean (m > 0)
        # root on the tiny reduced [rows, C] array
        if p_f == 2.0:
            return jnp.sqrt(m)
        if p_f == 4.0:
            return jnp.sqrt(jnp.sqrt(m))
        if p_f == 0.5:
            return m * m
        return jnp.exp(inv_p * jnp.log(m))                    # m ** (1/p)

    n_full = bt // sb
    tail = bt - n_full * sb

    def kernel(x_ref, o_ref):
        if n_full > 0:
            @pl.loop(0, n_full)
            def _(i):
                start = pl.multiple_of(i * sb, sb)
                xs = x_ref[pl.ds(start, sb)]
                o_ref[pl.ds(start, sb), :] = chunk_reduce(xs).astype(o_ref.dtype)
        if tail > 0:
            start = n_full * sb
            xs = x_ref[pl.ds(start, tail)]
            o_ref[pl.ds(start, tail), :] = chunk_reduce(xs).astype(o_ref.dtype)

    return kernel


def _cost_terms(p, n_in: int, n_out: int):
    """(flops, transcendentals) estimate for the chosen branch."""
    if p == 1 or p == float("inf"):
        return n_in + n_out, 0
    p_f = float(p)
    if _is_integer_power(p_f):
        n = int(p_f)
        muls = max(1, (n.bit_length() - 1) + (bin(n).count("1") - 1))
        return n_in * (2 + muls) + 2 * n_out, 2 * n_out
    if p_f == 0.5:
        return 2 * n_in + 2 * n_out, n_in + n_out
    return 3 * n_in + 2 * n_out, 2 * n_in + 2 * n_out


def global_descriptor(x: jax.Array, p=1, *, batch_tile: int | None = None,
                      chunk_rows: int | None = None) -> jax.Array:
    """Global pooling descriptor: [B, C, H, W] -> [B, C] (matches GlobalDescriptor)."""
    assert x.ndim == 4, (
        "the input tensor of GlobalDescriptor must be the shape of [B, C, H, W]")
    B, C, H, W = x.shape
    HW = H * W
    x3 = x.reshape(B, C, HW)                      # contiguous reshape, no data movement

    dtype = x.dtype
    itemsize = jnp.dtype(dtype).itemsize
    sub = _sublane_multiple(dtype)
    c_pad = _round_up(C, sub)                     # sublane-padded channel extent
    hw_pad = _round_up(HW, _LANE)                 # lane-padded spatial extent
    row_in_bytes = c_pad * hw_pad * itemsize      # PADDED bytes of one batch row
    row_f32_bytes = c_pad * hw_pad * 4

    vmem_cap = _vmem_capacity_bytes()
    usable = int(vmem_cap * 0.75)                 # headroom for compiler scratch
    in_budget = (usable - _TEMP_ALLOWANCE - (2 << 20)) // 2   # double-buffered input
    in_budget = max(4 << 20, min(_MAX_IN_BLOCK_BYTES, in_budget))

    # --- batch tile (rows per grid step) ---
    if batch_tile is not None:
        bt = max(1, min(int(batch_tile), B))
    else:
        bt = max(1, in_budget // row_in_bytes)
        if bt < B and B >= 4 * sub:
            # keep >=~4 grid steps: lets v7x's 2 TCs split the grid + keeps pipelining
            bt = min(bt, _round_up(_ceil_div(B, 4), sub))
    if bt >= B:
        bt = B                                    # full extent: always a legal block
    else:
        bt = max(sub, (bt // sub) * sub)          # output block sublane legality
        bt = min(bt, B)

    # --- in-kernel sub-batch chunk (bounds the f32 temporaries) ---
    if chunk_rows is not None:
        sb = max(1, min(int(chunk_rows), bt))
    else:
        sb = max(1, _CHUNK_F32_BYTES // row_f32_bytes)
        if sb > sub:
            sb = (sb // sub) * sub                # sublane-aligned stores when possible
        sb = min(sb, bt)

    grid = (_ceil_div(B, bt),)                    # ragged last block handled by Pallas

    # Honest VMEM accounting from PADDED block sizes + chunk temporaries + slack.
    in_block = bt * row_in_bytes
    out_block = _round_up(bt, sub) * _round_up(C, _LANE) * itemsize
    chunk_f32 = sb * row_f32_bytes
    vmem_limit = 2 * (in_block + out_block) + 3 * chunk_f32 + (4 << 20)
    vmem_limit = int(max(16 << 20, min(vmem_limit, int(vmem_cap * 0.85))))

    n_in = B * C * HW
    n_out = B * C
    flops, trans = _cost_terms(p, n_in, n_out)
    cost = pl.CostEstimate(
        flops=int(flops),
        transcendentals=int(trans),
        bytes_accessed=int(n_in * itemsize + n_out * itemsize),
    )

    kernel = _make_pool_kernel(p, HW, bt, sb)

    return pl.pallas_call(
        kernel,
        out_shape=jax.ShapeDtypeStruct((B, C), dtype),
        grid_spec=pltpu.PrefetchScalarGridSpec(
            num_scalar_prefetch=0,
            grid=grid,
            in_specs=[pl.BlockSpec((bt, C, HW), lambda i: (i, 0, 0))],
            out_specs=pl.BlockSpec((bt, C), lambda i: (i, 0)),
        ),
        compiler_params=pltpu.CompilerParams(
            dimension_semantics=("parallel",),    # batch rows independent -> megacore split
            vmem_limit_bytes=vmem_limit,
        ),
        cost_estimate=cost,
    )(x3)


if __name__ == "__main__":
    key = jax.random.PRNGKey(0)

    # --- base shapes: B=2, C=4, H=W=16 (spatial multiple of 128 lanes after reshape) ---
    B, C, H, W = 2, 4, 16, 16
    x = jax.random.normal(key, (B, C, H, W), dtype=jnp.float32)

    # p = 1 : mean pooling (module default)
    y1 = jax.block_until_ready(global_descriptor(x, p=1))
    ref1 = jnp.mean(x, axis=(-1, -2))
    assert y1.shape == (B, C) and y1.dtype == x.dtype
    assert jnp.allclose(y1, ref1, atol=1e-5, rtol=1e-5), "p=1 mismatch vs reference"

    # p = inf : max pooling
    yi = jax.block_until_ready(global_descriptor(x, p=float("inf")))
    refi = jnp.max(x, axis=(-1, -2))
    assert jnp.allclose(yi, refi, atol=1e-5, rtol=1e-5), "p=inf mismatch vs reference"

    # p = 3 : GeM pooling (integer multiply-chain path)
    y3 = jax.block_until_ready(global_descriptor(x, p=3))
    ref3 = jnp.mean(jnp.maximum(x, _CLAMP_MIN) ** 3, axis=(-1, -2)) ** (1.0 / 3.0)
    assert jnp.allclose(y3, ref3, atol=1e-5, rtol=1e-5), "p=3 (GeM) mismatch vs reference"

    # p = 2.5 : GeM pooling (fractional p -> exp/log path)
    y25 = jax.block_until_ready(global_descriptor(x, p=2.5))
    ref25 = jnp.mean(jnp.maximum(x, _CLAMP_MIN) ** 2.5, axis=(-1, -2)) ** (1.0 / 2.5)
    assert jnp.allclose(y25, ref25, atol=1e-4, rtol=1e-4), "p=2.5 (GeM) mismatch vs reference"

    # Ragged grid + in-kernel chunk loop + non-multiple-of-128 spatial (HW=49):
    B2, C2, H2, W2 = 20, 4, 7, 7
    x2 = jax.random.normal(jax.random.PRNGKey(1), (B2, C2, H2, W2), dtype=jnp.float32)
    y2 = jax.block_until_ready(global_descriptor(x2, p=3, batch_tile=8, chunk_rows=3))
    ref2 = jnp.mean(jnp.maximum(x2, _CLAMP_MIN) ** 3, axis=(-1, -2)) ** (1.0 / 3.0)
    assert jnp.allclose(y2, ref2, atol=1e-5, rtol=1e-5), "ragged GeM mismatch vs reference"

    # bf16 max pooling in native dtype (no f32 upcast in the kernel)
    xb = jax.random.normal(jax.random.PRNGKey(2), (B, C, H, W), dtype=jnp.bfloat16)
    yb = jax.block_until_ready(global_descriptor(xb, p=float("inf")))
    refb = jnp.max(xb, axis=(-1, -2))
    assert yb.dtype == jnp.bfloat16
    assert jnp.allclose(yb.astype(jnp.float32), refb.astype(jnp.float32)), "bf16 max mismatch"

    print("KERNEL_OK")
</pallas_src>

<mosaic_0001>
module attributes {stable_mosaic.version = 11 : i64} {
  func.func @kernel(%arg0: i32, %arg1: memref<2x4x256xf32, #tpu.memory_space<vmem>>, %arg2: memref<2x4xf32, #tpu.memory_space<vmem>>) attributes {dimension_semantics = [#tpu.dimension_semantics<parallel>], iteration_bounds = array<i64: 1>, scalar_prefetch = 0 : i64, scratch_operands = 0 : i64, tpu.core_type = #tpu.core_type<tc>, window_params = [{transform_indices = @transform_0, window_bounds = array<i64: 2, 4, 256>}, {transform_indices = @transform_1, window_bounds = array<i64: 2, 4>}]} {
    %c0_i32 = arith.constant 0 : i32
    %c1_i32 = arith.constant 1 : i32
    %0 = arith.muli %c0_i32, %c1_i32 : i32
    %c0_i32_0 = arith.constant 0 : i32
    %1 = arith.addi %c0_i32_0, %0 : i32
    %c2_i32 = arith.constant 2 : i32
    %2 = arith.muli %1, %c2_i32 : i32
    %3 = tpu.assume_multiple %2, 2 : i32
    %4 = arith.index_cast %3 : i32 to index
    %c0 = arith.constant 0 : index
    %c0_1 = arith.constant 0 : index
    %5 = vector.load %arg1[%4, %c0, %c0_1] : memref<2x4x256xf32, #tpu.memory_space<vmem>>, vector<2x4x256xf32>
    %cst = arith.constant dense<0.000000e+00> : vector<2x4xf32>
    %6 = vector.multi_reduction <add>, %5, %cst [2] : vector<2x4x256xf32> to vector<2x4xf32>
    %cst_2 = arith.constant 3.906250e-03 : f32
    %7 = vector.broadcast %cst_2 : f32 to vector<2x4xf32>
    %8 = arith.mulf %6, %7 : vector<2x4xf32>
    %9 = arith.index_cast %3 : i32 to index
    %c0_3 = arith.constant 0 : index
    %10 = vector.load %arg2[%9, %c0_3] : memref<2x4xf32, #tpu.memory_space<vmem>>, vector<2x4xf32>
    tpu.vector_store %arg2[%9, %c0_3], %8 {strides = array<i32>} : memref<2x4xf32, #tpu.memory_space<vmem>>, vector<2x4xf32>,
    %c1_i32_4 = arith.constant 1 : i32
    return
  }
  func.func @transform_0(%arg0: i32) -> (i32, i32, i32) {
    %c0_i32 = arith.constant 0 : i32
    %c0_i32_0 = arith.constant 0 : i32
    %c0_i32_1 = arith.constant 0 : i32
    return %arg0, %c0_i32, %c0_i32_0 : i32, i32, i32
  }
  func.func @transform_1(%arg0: i32) -> (i32, i32) {
    %c0_i32 = arith.constant 0 : i32
    %c0_i32_0 = arith.constant 0 : i32
    return %arg0, %c0_i32 : i32, i32
  }
}

</mosaic_0001>

<bundles_post_ra>
// kernel: tpu_custom_call.1
= control target key start
LH: loop header
LB: loop body
LE: loop exit
PB: predicated region body
PF: predicated region fallthrough
CT: control target
= control target key end

     0   :  { %6 = vsyncpa [#allocation3], 0  ;;  %s171_s0 = inlined_call_operand.hbm [shape: f32[2,4,256], index: 0, kind: input, shape index: {}]   ;;  %s172_s1 = inlined_call_operand.hbm [shape: f32[2,4], index: 1, kind: output, shape index: {}]  }
   0x1   :  { %7 = vsyncpa [#allocation4], 0  ;;  %s133_s6 = smov [#allocation2]   ;;  %s85_s10 = scalar_lea.hbm %s171_s0, 256 }
   0x2   :  { %s13_s7 = sshll.u32 %s133_s6, 4  ;;  %p86_p0 = scmp.ne.s32.totalorder %s171_s0, %s85_s10  ;;  %s14_s7 = int_to_ptr.vmem [resolvable:$true] %s13_s7 }
   0x3   :  { %p89_p1 = scmp.lt.u32.totalorder %s85_s10, %s171_s0 }
   0x5   :  { %p91_p2 = pnand %p89_p1, %p86_p0 }
   0x7   :  { %94 = shalt.err (!%p91_p2)
}
   0x8   :  { %s95_s15 = scalar_lea.vmem %s14_s7, 256  ;;  %p100_p4 = scmp.lt.s32.totalorder %s14_s7, %s14_s7 }
   0x9   :  { %p96_p3 = scmp.ne.s32.totalorder %s14_s7, %s95_s15  ;;  %p101_p5 = scmp.lt.s32.totalorder %s95_s15, %s95_s15 }
   0xb   :  { %p102_p6 = por %p101_p5, %p100_p4 }
   0xd   :  { %p103_p7 = pnand %p102_p6, %p96_p3 }
   0xf   :  { %106 = shalt.err (!%p103_p7)
}
  0x10   :  { %s134_s16 = smov 128   ;;  %s135_s17 = smov 8  }
  0x11   :  { %19 = dma.hbm_to_vmem [thread:$0]  %s171_s0, 256, %s14_s7, [#allocation3], %s134_s16, %s134_s16, %s135_s17  }
  0x12   :  { %129 = dma.done.wait [#allocation3], 256  }
  0x13   :  { %130 = vsyncadd [#allocation3], 4294967040  ;;  %vm34_vm0 = vcmask 1043456   ;;  %v26_v0 = vld [vmem:[#allocation2] sm:$0xff]  ;;  %v27_v1 = vld [vmem:[#allocation2 + $0x8] sm:$0xff]  ;;  %v49_v10 = vlaneseq  ;;  %s136_s0 = smov [#allocation5]  }
  0x14   :  { %v30_v2 = vcombine.high %v26_v0, %v26_v0  ;;  %v35_v3 = vsel %vm34_vm0, %v26_v0, 0.0  ;;  %v31_v4 = vcombine.high %v27_v1, %v27_v1  ;;  %v40_v6 = vsel %vm34_vm0, %v27_v1, 0.0  ;;  %s70_s20 = sshll.u32 %s136_s0, 4  ;;  %s71_s20 = int_to_ptr.vmem [resolvable:$true] %s70_s20 }
  0x15   :  { %v50_v11 = vand.u32 127, %v49_v10  ;;  %v52_v12 = vshrl.u32 %v49_v10, 7  ;;  %vm59_vm1 = vcmask 1041409   ;;  %vm62_vm2 = vcmask 25600   ;;  %s107_s21 = scalar_lea.vmem %s71_s20, 32  ;;  %p112_p9 = scmp.lt.s32.totalorder %s71_s20, %s71_s20 }
  0x16   :  { %v36_v5 = vsel %vm34_vm0, %v30_v2, 0.0  ;;  %v41_v7 = vsel %vm34_vm0, %v31_v4, 0.0  ;;  %p108_p8 = scmp.ne.s32.totalorder %s71_s20, %s107_s21  ;;  %p113_p10 = scmp.lt.s32.totalorder %s107_s21, %s107_s21 }
  0x17   :  { %v37_v8 = vadd.f32 %v36_v5, %v35_v3  ;;  %v42_v9 = vadd.f32 %v41_v7, %v40_v6  ;;  %v53_v14 = vsub.s32 %v50_v11, %v52_v12 }
  0x18   :  { %p114_p11 = por %p113_p10, %p112_p9 }
  0x19   :  { %38 = vadd.xlane.f32.xlu0 %v37_v8 }
  0x1a   :  { %p115_p12 = pnand %p114_p11, %p108_p8 }
  0x1d   :  { %43 = vadd.xlane.f32.xlu0 %v42_v9 }
  0xa6   :  { %v39_v13 = vpop.xlane.xlu0 %38 }
  0xa7   :  { %v45_v15 = vmul.f32 0.00390625, %v39_v13 }
  0xa9   :  { %v54_v18 = vrot.slane %v45_v15, %v53_v14 }
  0xaa   :  { %v44_v16 = vpop.xlane.xlu0 %43 }
  0xab   :  { %v46_v17 = vmul.f32 0.00390625, %v44_v16 }
  0xad   :  { %v58_v19 = vrot.slane %v46_v17, %v53_v14 }
  0xaf   :  { %v60_v20 = vsel %vm59_vm1, %v58_v19, %v54_v18 }
  0xb0   :  { %63 = vst.msk [vmem:[#allocation5] sm:$0x3] %vm62_vm2, %v60_v20 }
  0xb1   :  { %118 = shalt.err (!%p115_p12)
}
  0xb2   :  { %s119_s24 = scalar_lea.hbm %s172_s1, 32 }
  0xb3   :  { %p120_p13 = scmp.ne.s32.totalorder %s172_s1, %s119_s24  ;;  %p123_p0 = scmp.lt.u32.totalorder %s119_s24, %s172_s1 }
  0xb5   :  { %p125_p1 = pnand %p123_p0, %p120_p13 }
  0xb7   :  { %128 = shalt.err (!%p125_p1)
}
  0xb8   :  { %73 = dma.vmem_to_hbm [thread:$0]  %s71_s20, 32, %s172_s1, [#allocation4]  }
  0xb9   :  { %131 = dma.done.wait [#allocation4], 32  }
  0xba   :  { %132 = vsyncadd [#allocation4], 4294967264 }
  0xbb   :  { %77 = vsyncpa [#allocation3], 1 }
  0xbc   :  { %78 = vsyncpa [#allocation4], 1 }

</bundles_post_ra>
